<compile_context>
chip_gen: v7x
topology: tpu7x:2x2x1
jax: 0.10.0
libtpu: 0.0.40
codegen_flags: <defaults>
</compile_context>

<pallas_src>
import numpy as np
import jax
import jax.numpy as jnp
from jax.experimental import pallas as pl
from jax.experimental.pallas import tpu as pltpu

# Column conventions (synthetic stand-ins for spine constants)
BATCH_COL = 0
COORD_COLS = (1, 2, 3)
CLUST_COL = 5
GROUP_COL = 6
PRGRP_COL = 10   # primary-group (shower-primary) label column

LANES = 128          # lane width of a vreg
ROW_ALIGN = 32       # sublane-row alignment (int8 native tile is (32, 128))
MAX_TILE_ROWS = 2048 # rows per grid step: 2048*128*(4+1)B ~= 1.3 MiB moved/step


def _choose_tiling(num_clusters):
    """Pick (tile_rows, num_tiles, rows_total) for the padded cluster axis."""
    rows = max(1, -(-num_clusters // LANES))          # ceil(C / 128)
    rows = -(-rows // ROW_ALIGN) * ROW_ALIGN          # multiple of 32 sublanes
    tile_rows = min(MAX_TILE_ROWS, rows)
    num_tiles = -(-rows // tile_rows)
    rows_total = num_tiles * tile_rows
    return tile_rows, num_tiles, rows_total


def _shower_primary_loss_kernel(d_ref, ids_ref, out_ref):
    """One (TR, 128) tile of the masked binary-CE / accuracy reduction.

    d_ref   : (TR, 128) f32  -- logit difference l1 - l0 per cluster
    ids_ref : (TR, 128) i8   -- primary id per cluster; -1 = invalid/padding
    out_ref : (3, 8, 128) f32 resident accumulator [loss, correct, count]
    """
    # Zero the resident accumulator slab on the first reduction step.
    @pl.when(pl.program_id(0) == 0)
    def _():
        out_ref[...] = jnp.zeros_like(out_ref)

    d = d_ref[...]                               # (TR, 128) f32
    ids = ids_ref[...].astype(jnp.int32)         # unpack int8 once

    valid = (ids >= 0).astype(jnp.float32)
    # Labels are assumed to be in {-1, 0, 1}; any label > 1 is treated as
    # class 0 (the original 2-class torch CE would be undefined for it).
    is_one = ids == 1

    # Stable 2-class CE-with-logits: CE = softplus(l_other - l_target).
    z = jnp.where(is_one, -d, d)
    ce = (jnp.maximum(z, 0.0) + jnp.log1p(jnp.exp(-jnp.abs(z)))) * valid

    # torch.argmax picks index 0 on ties -> predicted class is 1 iff l1 > l0.
    correct = jnp.where((d > 0.0) == is_one, valid, 0.0)

    # Reduce the tile to (8, 128) partials in registers (one add per input
    # vreg, pure VALU), then a single RMW of the resident accumulator per
    # quantity per tile.
    tr = d.shape[0]
    out_ref[0, :, :] += ce.reshape(tr // 8, 8, LANES).sum(axis=0)
    out_ref[1, :, :] += correct.reshape(tr // 8, 8, LANES).sum(axis=0)
    out_ref[2, :, :] += valid.reshape(tr // 8, 8, LANES).sum(axis=0)


@jax.jit
def _masked_ce_and_acc(node_pred, primary_ids):
    """node_pred: (C, 2) float logits; primary_ids: (C,) int32, -1 = invalid."""
    C = node_pred.shape[0]
    tile_rows, num_tiles, rows_total = _choose_tiling(C)
    C_pad = rows_total * LANES

    # The 2-class CE and argmax only depend on d = l1 - l0; computing it here
    # is a single fused elementwise pass (no transpose/repack) and halves the
    # kernel's logit HBM traffic.
    logits = node_pred.astype(jnp.float32)
    d = jnp.pad(logits[:, 1] - logits[:, 0], (0, C_pad - C))
    d = d.reshape(rows_total, LANES)

    # int8 label stream, -1 marks invalid / padding.
    ids = jnp.pad(primary_ids.astype(jnp.int8), (0, C_pad - C),
                  constant_values=-1).reshape(rows_total, LANES)

    out = pl.pallas_call(
        _shower_primary_loss_kernel,
        out_shape=jax.ShapeDtypeStruct((3, 8, LANES), jnp.float32),
        grid=(num_tiles,),
        in_specs=[pl.BlockSpec((tile_rows, LANES), lambda i: (i, 0)),
                  pl.BlockSpec((tile_rows, LANES), lambda i: (i, 0))],
        out_specs=pl.BlockSpec((3, 8, LANES), lambda i: (0, 0, 0)),
        compiler_params=pltpu.CompilerParams(
            dimension_semantics=("arbitrary",)),
    )(d, ids)

    sums = jnp.sum(out, axis=(1, 2))             # [loss_sum, corr_sum, count]
    loss_sum, corr_sum, count = sums[0], sums[1], sums[2]

    safe = jnp.maximum(count, 1.0)
    # loss = sum(CE) / count if count else sum(CE);  acc = 1.0 if count == 0.
    loss = jnp.where(count > 0, loss_sum / safe, loss_sum)
    acc = jnp.where(count > 0, corr_sum / safe, 1.0)
    return loss, acc, count.astype(jnp.int32)


class NodeShowerPrimaryLoss:
    """JAX/Pallas re-implementation of the shower-primary node loss.

    Default configuration only (balance_loss=False, high_purity=False,
    use_closest=False), matching the PyTorch module defaults.  Primary-group
    labels are assumed to lie in {-1, 0, 1}.
    """

    name = 'shower_primary'

    def __init__(self, balance_loss=False, high_purity=False, use_closest=False,
                 use_group_pred=False, group_pred_alg='score', loss='ce'):
        assert loss == 'ce'
        self.balance_loss = balance_loss
        self.high_purity = high_purity
        self.use_closest = use_closest
        self.use_group_pred = use_group_pred
        self.group_pred_alg = group_pred_alg
        # TODO(synk): balance_loss / high_purity / use_closest branches of the
        # original module are not implemented (default config covered only).

    def __call__(self, clust_label, clusts, node_pred, coord_label=None,
                 group_pred=None, **kwargs):
        # get_cluster_label: every voxel of a cluster shares the same PRGRP
        # label, so gathering the first voxel's label is equivalent.
        # TODO(synk): `clusts` is a ragged Python index list, so the first-voxel
        # index extraction stays host-side (vectorized, no per-element int()).
        if isinstance(clusts, np.ndarray) and clusts.ndim == 2:
            first_idx = clusts[:, 0].astype(np.int32)
        else:
            first_idx = np.fromiter((c[0] for c in clusts), dtype=np.int32,
                                    count=len(clusts))
        first_idx = jnp.asarray(first_idx)
        primary_ids = clust_label[first_idx, PRGRP_COL].astype(jnp.int32)

        loss, acc, count = _masked_ce_and_acc(node_pred, primary_ids)
        return {'accuracy': acc, 'loss': loss, 'count': count}


if __name__ == "__main__":
    key = jax.random.PRNGKey(0)
    k_coord, k_label, k_pred = jax.random.split(key, 3)

    # Small synthetic batch: N voxels, C clusters of equal size, D = 3 coords.
    N, C, D = 64, 8, 3
    n_cols = PRGRP_COL + 1                     # (N, 1 + D + N_f) layout
    vox_per_clust = N // C

    # Clusters: contiguous chunks of voxel indices.
    clusts = [np.arange(i * vox_per_clust, (i + 1) * vox_per_clust)
              for i in range(C)]

    # Per-cluster primary labels in {-1, 0, 1}; broadcast to every voxel.
    clust_primary = jax.random.randint(k_label, (C,), -1, 2, dtype=jnp.int32)
    voxel_primary = jnp.repeat(clust_primary, vox_per_clust)

    clust_label = jnp.zeros((N, n_cols), jnp.float32)
    clust_label = clust_label.at[:, list(COORD_COLS)].set(
        jax.random.normal(k_coord, (N, D), jnp.float32))
    clust_label = clust_label.at[:, CLUST_COL].set(
        jnp.repeat(jnp.arange(C, dtype=jnp.float32), vox_per_clust))
    clust_label = clust_label.at[:, PRGRP_COL].set(voxel_primary.astype(jnp.float32))

    # Node prediction logits (C, 2).
    node_pred = jax.random.normal(k_pred, (C, 2), jnp.float32)

    loss_mod = NodeShowerPrimaryLoss()
    out = loss_mod(clust_label, clusts, node_pred)
    out = jax.tree_util.tree_map(jax.block_until_ready, out)

    # Sanity check against a pure-numpy reference of the default forward pass.
    np_primary = np.asarray(clust_primary)
    np_pred = np.asarray(node_pred)
    valid = np.where(np_primary > -1)[0]
    if len(valid):
        lp = np_pred[valid].astype(np.float64)
        y = np_primary[valid]
        m = lp.max(axis=1, keepdims=True)
        lse = (m[:, 0] + np.log(np.exp(lp - m).sum(axis=1)))
        ref_loss = float(np.sum(lse - lp[np.arange(len(valid)), y])) / len(valid)
        ref_acc = float(np.sum(np.argmax(lp, axis=1) == y)) / len(valid)
    else:
        ref_loss, ref_acc = 0.0, 1.0
    assert int(out['count']) == len(valid)
    assert abs(float(out['loss']) - ref_loss) < 1e-4
    assert abs(float(out['accuracy']) - ref_acc) < 1e-5

    print("KERNEL_OK")
</pallas_src>

<mosaic_0001>
module attributes {stable_mosaic.version = 11 : i64} {
  func.func @_shower_primary_loss_kernel(%arg0: i32, %arg1: memref<32x128xf32, #tpu.memory_space<vmem>>, %arg2: memref<32x128xi8, #tpu.memory_space<vmem>>, %arg3: memref<3x8x128xf32, #tpu.memory_space<vmem>>) attributes {dimension_semantics = [#tpu.dimension_semantics<arbitrary>], iteration_bounds = array<i64: 1>, scalar_prefetch = 0 : i64, scratch_operands = 0 : i64, tpu.core_type = #tpu.core_type<tc>, window_params = [{transform_indices = @transform_0, window_bounds = array<i64: 32, 128>}, {transform_indices = @transform_1, window_bounds = array<i64: 32, 128>}, {pipeline_mode = #tpu.pipeline_mode<synchronous>, transform_indices = @transform_2, window_bounds = array<i64: 3, 8, 128>}]} {
    %c0_i32 = arith.constant 0 : i32
    %0 = arith.cmpi eq, %arg0, %c0_i32 : i32
    %1 = arith.extui %0 : i1 to i32
    %c0_i32_0 = arith.constant 0 : i32
    %2 = arith.cmpi ne, %1, %c0_i32_0 : i32
    scf.if %2 {
      %cst_29 = arith.constant 0.000000e+00 : f32
      %54 = vector.broadcast %cst_29 : f32 to vector<3x8x128xf32>
      %c0_30 = arith.constant 0 : index
      %c0_31 = arith.constant 0 : index
      %c0_32 = arith.constant 0 : index
      %55 = vector.load %arg3[%c0_30, %c0_31, %c0_32] : memref<3x8x128xf32, #tpu.memory_space<vmem>>, vector<3x8x128xf32>
      tpu.vector_store %arg3[%c0_30, %c0_31, %c0_32], %54 {strides = array<i32>} : memref<3x8x128xf32, #tpu.memory_space<vmem>>, vector<3x8x128xf32>,
    } else {
    }
    %c0 = arith.constant 0 : index
    %c0_1 = arith.constant 0 : index
    %3 = vector.load %arg1[%c0, %c0_1] : memref<32x128xf32, #tpu.memory_space<vmem>>, vector<32x128xf32>
    %c0_2 = arith.constant 0 : index
    %c0_3 = arith.constant 0 : index
    %4 = vector.load %arg2[%c0_2, %c0_3] : memref<32x128xi8, #tpu.memory_space<vmem>>, vector<32x128xi8>
    %5 = arith.extsi %4 : vector<32x128xi8> to vector<32x128xi32>
    %c0_i32_4 = arith.constant 0 : i32
    %6 = vector.broadcast %c0_i32_4 : i32 to vector<32x128xi32>
    %7 = arith.cmpi sge, %5, %6 : vector<32x128xi32>
    %8 = arith.extui %7 : vector<32x128xi1> to vector<32x128xi32>
    %9 = arith.sitofp %8 : vector<32x128xi32> to vector<32x128xf32>
    %c1_i32 = arith.constant 1 : i32
    %10 = vector.broadcast %c1_i32 : i32 to vector<32x128xi32>
    %11 = arith.cmpi eq, %5, %10 : vector<32x128xi32>
    %cst = arith.constant 0.000000e+00 : f32
    %12 = vector.broadcast %cst : f32 to vector<32x128xf32>
    %13 = arith.subf %12, %3 : vector<32x128xf32>
    %14 = arith.select %11, %13, %3 : vector<32x128xi1>, vector<32x128xf32>
    %cst_5 = arith.constant 0.000000e+00 : f32
    %15 = vector.broadcast %cst_5 : f32 to vector<32x128xf32>
    %16 = arith.maximumf %14, %15 : vector<32x128xf32>
    %17 = math.absf %14 : vector<32x128xf32>
    %cst_6 = arith.constant 0.000000e+00 : f32
    %18 = vector.broadcast %cst_6 : f32 to vector<32x128xf32>
    %19 = arith.subf %18, %17 : vector<32x128xf32>
    %20 = math.exp %19 : vector<32x128xf32>
    %21 = math.log1p %20 : vector<32x128xf32>
    %22 = arith.addf %16, %21 : vector<32x128xf32>
    %23 = arith.mulf %22, %9 : vector<32x128xf32>
    %cst_7 = arith.constant 0.000000e+00 : f32
    %24 = vector.broadcast %cst_7 : f32 to vector<32x128xf32>
    %25 = arith.cmpf ogt, %3, %24 : vector<32x128xf32>
    %26 = arith.xori %25, %11 : vector<32x128xi1>
    %cst_8 = arith.constant dense<true> : vector<32x128xi1>
    %27 = arith.xori %26, %cst_8 : vector<32x128xi1>
    %cst_9 = arith.constant 0.000000e+00 : f32
    %28 = vector.broadcast %cst_9 : f32 to vector<32x128xf32>
    %29 = arith.select %27, %9, %28 : vector<32x128xi1>, vector<32x128xf32>
    %c0_10 = arith.constant 0 : index
    %c0_11 = arith.constant 0 : index
    %c0_12 = arith.constant 0 : index
    %30 = vector.load %arg3[%c0_10, %c0_11, %c0_12] : memref<3x8x128xf32, #tpu.memory_space<vmem>>, vector<1x8x128xf32>
    %31 = vector.shape_cast %30 : vector<1x8x128xf32> to vector<8x128xf32>
    %32 = vector.shape_cast %23 : vector<32x128xf32> to vector<4x8x128xf32>
    %cst_13 = arith.constant dense<0.000000e+00> : vector<8x128xf32>
    %33 = vector.multi_reduction <add>, %32, %cst_13 [0] : vector<4x8x128xf32> to vector<8x128xf32>
    %34 = arith.addf %31, %33 : vector<8x128xf32>
    %c0_14 = arith.constant 0 : index
    %c0_15 = arith.constant 0 : index
    %c0_16 = arith.constant 0 : index
    %35 = vector.load %arg3[%c0_14, %c0_15, %c0_16] : memref<3x8x128xf32, #tpu.memory_space<vmem>>, vector<1x8x128xf32>
    %36 = vector.shape_cast %35 : vector<1x8x128xf32> to vector<8x128xf32>
    %37 = vector.shape_cast %34 : vector<8x128xf32> to vector<1x8x128xf32>
    tpu.vector_store %arg3[%c0_14, %c0_15, %c0_16], %37 {strides = array<i32>} : memref<3x8x128xf32, #tpu.memory_space<vmem>>, vector<1x8x128xf32>,
    %c1 = arith.constant 1 : index
    %c0_17 = arith.constant 0 : index
    %c0_18 = arith.constant 0 : index
    %38 = vector.load %arg3[%c1, %c0_17, %c0_18] : memref<3x8x128xf32, #tpu.memory_space<vmem>>, vector<1x8x128xf32>
    %39 = vector.shape_cast %38 : vector<1x8x128xf32> to vector<8x128xf32>
    %40 = vector.shape_cast %29 : vector<32x128xf32> to vector<4x8x128xf32>
    %cst_19 = arith.constant dense<0.000000e+00> : vector<8x128xf32>
    %41 = vector.multi_reduction <add>, %40, %cst_19 [0] : vector<4x8x128xf32> to vector<8x128xf32>
    %42 = arith.addf %39, %41 : vector<8x128xf32>
    %c1_20 = arith.constant 1 : index
    %c0_21 = arith.constant 0 : index
    %c0_22 = arith.constant 0 : index
    %43 = vector.load %arg3[%c1_20, %c0_21, %c0_22] : memref<3x8x128xf32, #tpu.memory_space<vmem>>, vector<1x8x128xf32>
    %44 = vector.shape_cast %43 : vector<1x8x128xf32> to vector<8x128xf32>
    %45 = vector.shape_cast %42 : vector<8x128xf32> to vector<1x8x128xf32>
    tpu.vector_store %arg3[%c1_20, %c0_21, %c0_22], %45 {strides = array<i32>} : memref<3x8x128xf32, #tpu.memory_space<vmem>>, vector<1x8x128xf32>,
    %c2 = arith.constant 2 : index
    %c0_23 = arith.constant 0 : index
    %c0_24 = arith.constant 0 : index
    %46 = vector.load %arg3[%c2, %c0_23, %c0_24] : memref<3x8x128xf32, #tpu.memory_space<vmem>>, vector<1x8x128xf32>
    %47 = vector.shape_cast %46 : vector<1x8x128xf32> to vector<8x128xf32>
    %48 = vector.shape_cast %9 : vector<32x128xf32> to vector<4x8x128xf32>
    %cst_25 = arith.constant dense<0.000000e+00> : vector<8x128xf32>
    %49 = vector.multi_reduction <add>, %48, %cst_25 [0] : vector<4x8x128xf32> to vector<8x128xf32>
    %50 = arith.addf %47, %49 : vector<8x128xf32>
    %c2_26 = arith.constant 2 : index
    %c0_27 = arith.constant 0 : index
    %c0_28 = arith.constant 0 : index
    %51 = vector.load %arg3[%c2_26, %c0_27, %c0_28] : memref<3x8x128xf32, #tpu.memory_space<vmem>>, vector<1x8x128xf32>
    %52 = vector.shape_cast %51 : vector<1x8x128xf32> to vector<8x128xf32>
    %53 = vector.shape_cast %50 : vector<8x128xf32> to vector<1x8x128xf32>
    tpu.vector_store %arg3[%c2_26, %c0_27, %c0_28], %53 {strides = array<i32>} : memref<3x8x128xf32, #tpu.memory_space<vmem>>, vector<1x8x128xf32>,
    return
  }
  func.func @transform_0(%arg0: i32) -> (i32, i32) {
    %c0_i32 = arith.constant 0 : i32
    %c0_i32_0 = arith.constant 0 : i32
    return %arg0, %c0_i32 : i32, i32
  }
  func.func @transform_1(%arg0: i32) -> (i32, i32) {
    %c0_i32 = arith.constant 0 : i32
    %c0_i32_0 = arith.constant 0 : i32
    return %arg0, %c0_i32 : i32, i32
  }
  func.func @transform_2(%arg0: i32) -> (i32, i32, i32) {
    %c0_i32 = arith.constant 0 : i32
    %c0_i32_0 = arith.constant 0 : i32
    %c0_i32_1 = arith.constant 0 : i32
    %c0_i32_2 = arith.constant 0 : i32
    return %c0_i32, %c0_i32_0, %c0_i32_1 : i32, i32, i32
  }
}

</mosaic_0001>

<bundles_post_ra>
// kernel: _masked_ce_and_acc.1
= control target key start
LH: loop header
LB: loop body
LE: loop exit
PB: predicated region body
PF: predicated region fallthrough
CT: control target
= control target key end

     0   :  { %v181_v22 = vmov 0.0   ;;  %s332_s0 = inlined_call_operand.vmem [shape: f32[32,128], index: 0, kind: input, shape index: {}]   ;;  %s333_s1 = inlined_call_operand.vmem [shape: s8[32,128], index: 1, kind: input, shape index: {}]   ;;  %s334_s2 = inlined_call_operand.vmem [shape: f32[3,8,128], index: 2, kind: output, shape index: {}]  }
   0x1   :  { %v18_v0 = vld [vmem:[%s332_s0] sm:$0xff]  ;;  %v19_v1 = vld [vmem:[%s332_s0 + $0x8] sm:$0xff]  ;;  %v20_v2 = vld [vmem:[%s332_s0 + $0x10] sm:$0xff] }
   0x2   :  { %v21_v3 = vld [vmem:[%s332_s0 + $0x18] sm:$0xff]  ;;  %v22_v4 = vld [vmem:[%s333_s1] sm:$0xff]  ;;  %v43_v9 = vsub.f32 0.0, %v18_v0  ;;  %v44_v10 = vsub.f32 0.0, %v19_v1  ;;  %v45_v11 = vsub.f32 0.0, %v20_v2  ;;  %vm115_vm0 = vcmp.gt.f32.partialorder %v18_v0, 0.0 }
   0x3   :  { %v23_v5 = vunpack.c.0.s8 %v22_v4  ;;  %v24_v6 = vunpack.c.1.s8 %v22_v4  ;;  %v25_v7 = vunpack.c.2.s8 %v22_v4  ;;  %v26_v8 = vunpack.c.3.s8 %v22_v4 }
   0x4   :  { %v46_v12 = vsub.f32 0.0, %v21_v3  ;;  %vm116_vm1 = vcmp.gt.f32.partialorder %v19_v1, 0.0  ;;  %vm117_vm2 = vcmp.gt.f32.partialorder %v20_v2, 0.0  ;;  %vm118_vm6 = vcmp.gt.f32.partialorder %v21_v3, 0.0 }
   0x5   :  { %vm27_vm3 = vcmp.ge.s32.totalorder %v23_v5, 0  ;;  %vm28_vm4 = vcmp.ge.s32.totalorder %v24_v6, 0  ;;  %vm213_vm5 = vcmp.ge.s32.totalorder %v25_v7, 0  ;;  %vm39_vm7 = vcmp.eq.s32.totalorder %v23_v5, 1 }
   0x6   :  { %vm40_vm8 = vcmp.eq.s32.totalorder %v24_v6, 1  ;;  %vm217_vm9 = vcmp.eq.s32.totalorder %v25_v7, 1  ;;  %vm221_vm10 = vcmp.eq.s32.totalorder %v26_v8, 1  ;;  %v225_v16 = vsel %vm39_vm7, %v43_v9, %v18_v0  ;;  %vm238_vm11 = vmxor %vm115_vm0, %vm39_vm7 }
   0x7   :  { %v227_v17 = vsel %vm40_vm8, %v44_v10, %v19_v1  ;;  %v231_v18 = vsel %vm217_vm9, %v45_v11, %v20_v2  ;;  %v235_v19 = vsel %vm221_vm10, %v46_v12, %v21_v3  ;;  %vm242_vm12 = vcmp.ge.s32.totalorder %v26_v8, 0  ;;  %vm251_vm13 = vmxor %vm116_vm1, %vm40_vm8 }
   0x8   :  { %v246_v23 = vsel %vm27_vm3, 1.0, %v181_v22  ;;  %v248_v24 = vsel %vm28_vm4, 1.0, %v181_v22  ;;  %v55_v26 = vand.u32 2147483647, %v225_v16  ;;  %v56_v27 = vand.u32 2147483647, %v227_v17  ;;  %vm261_vm14 = vmxor %vm117_vm2, %vm217_vm9 }
   0x9   :  { %v57_v28 = vand.u32 2147483647, %v231_v18  ;;  %v146_v30 = vadd.f32 %v248_v24, %v246_v23  ;;  %v269_v31 = vsel %vm213_vm5, 1.0, %v181_v22  ;;  %v58_v32 = vand.u32 2147483647, %v235_v19  ;;  %vm275_vm15 = vmxor %vm118_vm6, %vm221_vm10 }
   0xa   :  { %v59_v34 = vsub.f32 0.0, %v55_v26  ;;  %v60_v35 = vsub.f32 0.0, %v56_v27  ;;  %vm182_vm0 = vmmov 1   ;;  %v288_v39 = vsel %vm242_vm12, 1.0, %v181_v22 }
   0xb   :  { %v61_v36 = vsub.f32 0.0, %v57_v28  ;;  %vm281_vm1 = vmxor %vm238_vm11, %vm182_vm0  ;;  %v147_v38 = vadd.f32 %v269_v31, %v146_v30  ;;  %v62_v40 = vsub.f32 0.0, %v58_v32  ;;  %v51_v10 = vmax.f32 %v225_v16, 0.0 }
   0xc   :  { %vm124_vm2 = vmxor %vm251_vm13, %vm182_vm0  ;;  %v127_v41 = vsel %vm281_vm1, %v246_v23, 0.0  ;;  %v63_v42 = vmul.f32 1.442695, %v59_v34  ;;  %v65_v43 = vmul.f32 1.442695, %v60_v35  ;;  %v52_v15 = vmax.f32 %v227_v17, 0.0 }
   0xd   :  { %v67_v44 = vmul.f32 1.442695, %v61_v36  ;;  %vm125_vm3 = vmxor %vm261_vm14, %vm182_vm0  ;;  %v148_v45 = vadd.f32 %v288_v39, %v147_v38  ;;  %v69_v46 = vmul.f32 1.442695, %v62_v40  ;;  %v128_v47 = vsel %vm124_vm2, %v248_v24, 0.0 }
   0xe   :  { %vm126_vm4 = vmxor %vm275_vm15, %vm182_vm0  ;;  %v129_v48 = vsel %vm125_vm3, %v269_v31, 0.0  ;;  %165 = vpow2.f32 %v63_v42  ;;  %v139_v49 = vadd.f32 %v128_v47, %v127_v41  ;;  %v53_v26 = vmax.f32 %v231_v18, 0.0 }
   0xf   :  { %167 = vpow2.f32 %v65_v43  ;;  %v130_v50 = vsel %vm126_vm4, %v288_v39, 0.0  ;;  %162 = vst [vmem:[%s334_s2 + $0x10] sm:$0xff] %v148_v45  ;;  %v54_v32 = vmax.f32 %v235_v19, 0.0 }
  0x10   :  { %169 = vpow2.f32 %v67_v44  ;;  %v140_v51 = vadd.f32 %v139_v49, %v129_v48 }
  0x11   :  { %171 = vpow2.f32 %v69_v46 }
  0x12   :  { %v141_v52 = vadd.f32 %v140_v51, %v130_v50 }
  0x14   :  { %160 = vst [vmem:[%s334_s2 + $0x8] sm:$0xff] %v141_v52 }
  0x18   :  { %v166_v53 = vpop.eup %165 }
  0x19   :  { %v168_v54 = vpop.eup %167  ;;  %v71_v55 = vadd.f32 1.0, %v166_v53  ;;  %v74_v60 = vmul.f32 -0.5, %v166_v53  ;;  %v77_v2 = vand.u32 2147483647, %v166_v53 }
  0x1a   :  { %v170_v56 = vpop.eup %169  ;;  %v80_v57 = vadd.f32 1.0, %v168_v54  ;;  %v83_v61 = vmul.f32 -0.5, %v168_v54  ;;  %v86_v4 = vand.u32 2147483647, %v168_v54 }
  0x1b   :  { %v172_v58 = vpop.eup %171  ;;  %173 = vlog2.f32 %v71_v55  ;;  %v89_v59 = vadd.f32 1.0, %v170_v56  ;;  %v92_v63 = vmul.f32 -0.5, %v170_v56  ;;  %v75_v0 = vadd.f32 1.0, %v74_v60 }
  0x1c   :  { %175 = vlog2.f32 %v80_v57  ;;  %v98_v62 = vadd.f32 1.0, %v172_v58  ;;  %v101_v1 = vmul.f32 -0.5, %v172_v58  ;;  %v84_v3 = vadd.f32 1.0, %v83_v61 }
  0x1d   :  { %177 = vlog2.f32 %v89_v59  ;;  %v93_v5 = vadd.f32 1.0, %v92_v63  ;;  %v95_v6 = vand.u32 2147483647, %v170_v56  ;;  %v76_v7 = vmul.f32 %v166_v53, %v75_v0 }
  0x1e   :  { %179 = vlog2.f32 %v98_v62  ;;  %v102_v8 = vadd.f32 1.0, %v101_v1  ;;  %vm310_vm5 = vcmp.lt.f32.partialorder %v77_v2, 0.0004427343  ;;  %v85_v12 = vmul.f32 %v168_v54, %v84_v3 }
  0x1f   :  { %v104_v13 = vand.u32 2147483647, %v172_v58  ;;  %vm315_vm6 = vcmp.lt.f32.partialorder %v86_v4, 0.0004427343  ;;  %v94_v22 = vmul.f32 %v170_v56, %v93_v5  ;;  %vm96_vm7 = vcmp.lt.f32.partialorder %v95_v6, 0.0004427343 }
  0x20   :  { %v103_v29 = vmul.f32 %v172_v58, %v102_v8 }
  0x21   :  { %vm105_vm8 = vcmp.lt.f32.partialorder %v104_v13, 0.0004427343 }
  0x25   :  { %v174_v9 = vpop.eup %173 }
  0x26   :  { %v176_v14 = vpop.eup %175  ;;  %v73_v20 = vmul.f32 0.6931472, %v174_v9 }
  0x27   :  { %v178_v25 = vpop.eup %177  ;;  %v82_v27 = vmul.f32 0.6931472, %v176_v14 }
  0x28   :  { %v79_v16 = vsel %vm310_vm5, %v76_v7, %v73_v20  ;;  %v91_v28 = vmul.f32 0.6931472, %v178_v25  ;;  %v180_v30 = vpop.eup %179 }
  0x29   :  { %v88_v17 = vsel %vm315_vm6, %v85_v12, %v82_v27  ;;  %v107_v33 = vadd.f32 %v79_v16, %v51_v10  ;;  %v100_v35 = vmul.f32 0.6931472, %v180_v30 }
  0x2a   :  { %v97_v34 = vsel %vm96_vm7, %v94_v22, %v91_v28  ;;  %v108_v36 = vadd.f32 %v88_v17, %v52_v15 }
  0x2b   :  { %v109_v37 = vadd.f32 %v97_v34, %v53_v26  ;;  %v111_v18 = vmul.f32 %v246_v23, %v107_v33  ;;  %v106_v38 = vsel %vm105_vm8, %v103_v29, %v100_v35 }
  0x2c   :  { %v112_v40 = vmul.f32 %v248_v24, %v108_v36  ;;  %v110_v41 = vadd.f32 %v106_v38, %v54_v32 }
  0x2d   :  { %v113_v42 = vmul.f32 %v269_v31, %v109_v37 }
  0x2e   :  { %v132_v43 = vadd.f32 %v112_v40, %v111_v18  ;;  %v114_v19 = vmul.f32 %v288_v39, %v110_v41 }
  0x30   :  { %v133_v44 = vadd.f32 %v132_v43, %v113_v42 }
  0x32   :  { %v134_v45 = vadd.f32 %v133_v44, %v114_v19 }
  0x34   :  { %136 = vst [vmem:[%s334_s2] sm:$0xff] %v134_v45 }

</bundles_post_ra>
